<compile_context>
chip_gen: v6e
topology: v6e:2x2x1
jax: 0.10.0
libtpu: 0.0.40
codegen_flags: <defaults>
</compile_context>

<pallas_src>
import jax
import jax.numpy as jnp
from jax import lax
from jax.experimental import pallas as pl
from jax.experimental.pallas import tpu as pltpu


def _round_up(x, m):
    return (x + m - 1) // m * m


def _moe_kernel(x_ref, w_ref, b_ref, g_ref, o_ref, acc_ref):
    # x_ref:   (TM, D)      token tile
    # w_ref:   (1, D, TN)   expert-e weight slab, already (in, out) layout
    # b_ref:   (1, 1, TN)   expert-e bias slab
    # g_ref:   (TM, E)      dense gate scores for this token tile
    # o_ref:   (TM, TN)     output tile (written once, at the last expert)
    # acc_ref: (TM, TN) f32 VMEM accumulator
    e = pl.program_id(2)

    @pl.when(e == 0)
    def _():
        acc_ref[...] = jnp.zeros_like(acc_ref)

    x = x_ref[...]                      # (TM, D)
    w = w_ref[0]                        # (D, TN)
    bias = b_ref[0].astype(jnp.float32)  # (1, TN)

    # (TM, D) @ (D, TN) -> (TM, TN), f32 accumulation on the MXU.
    y = jnp.dot(x, w, preferred_element_type=jnp.float32) + bias

    # Select gate column e for every token in the tile: (TM, E) -> (TM, 1).
    # iota/compare/select is VPU work, the lane-reduce goes to the XLU.
    g_full = g_ref[...].astype(jnp.float32)
    col = lax.broadcasted_iota(jnp.int32, g_full.shape, 1)
    g = jnp.sum(jnp.where(col == e, g_full, 0.0), axis=1, keepdims=True)

    acc_ref[...] += g * y

    @pl.when(e == pl.num_programs(2) - 1)
    def _():
        o_ref[...] = acc_ref[...].astype(o_ref.dtype)


def brute_force_moe(inp, gate_idx, gate_score, weights, biases):
    """inp: (B, D), gate_idx: (B, K) i32, gate_score: (B, K),
       weights: (E, D_out, D_in) (nn.Linear layout), biases: (E, D) -> (B, D)."""
    B, D = inp.shape
    E = weights.shape[0]
    assert D % 128 == 0, "d_model must be a multiple of 128 (pad lanes otherwise)"

    # Dense (B, E) gate matrix; scatter-add handles duplicate expert indices.
    gate_dense = jnp.zeros((B, E), jnp.float32).at[
        jnp.arange(B)[:, None], gate_idx].add(gate_score.astype(jnp.float32))

    # Pre-transpose weights to (E, D_in, D_out): no transpose inside the kernel.
    w_t = jnp.swapaxes(weights, 1, 2)
    b3 = biases.reshape(E, 1, D)

    # Token tile: >= 8 sublanes, up to 128 for full MXU M.
    tm = min(128, _round_up(B, 8))
    b_pad = _round_up(B, tm)
    # D_out tile: largest of {512, 256, 128} dividing D (keeps weight slabs
    # double-bufferable within v7x's smaller VMEM for large d_model).
    tn = D
    for cand in (512, 256, 128):
        if D % cand == 0:
            tn = min(D, cand) if D <= cand else cand
            break

    x_pad = jnp.zeros((b_pad, D), inp.dtype).at[:B].set(inp)
    g_pad = jnp.zeros((b_pad, E), jnp.float32).at[:B].set(gate_dense)

    grid = (b_pad // tm, D // tn, E)

    grid_spec = pltpu.PrefetchScalarGridSpec(
        num_scalar_prefetch=0,
        grid=grid,
        in_specs=[
            pl.BlockSpec((tm, D), lambda m, n, e: (m, 0)),      # tokens
            pl.BlockSpec((1, D, tn), lambda m, n, e: (e, 0, n)),  # weights
            pl.BlockSpec((1, 1, tn), lambda m, n, e: (e, 0, n)),  # biases
            pl.BlockSpec((tm, E), lambda m, n, e: (m, 0)),      # dense gates
        ],
        out_specs=pl.BlockSpec((tm, tn), lambda m, n, e: (m, n)),
        scratch_shapes=[pltpu.VMEM((tm, tn), jnp.float32)],
    )

    itemsize = jnp.dtype(weights.dtype).itemsize
    cost = pl.CostEstimate(
        flops=2 * b_pad * E * D * D,
        transcendentals=0,
        bytes_accessed=(grid[0] * E * D * D * itemsize          # weight traffic
                        + b_pad * D * inp.dtype.itemsize * 2    # x read + out write
                        + b_pad * E * 4),
    )

    out = pl.pallas_call(
        _moe_kernel,
        out_shape=jax.ShapeDtypeStruct((b_pad, D), inp.dtype),
        grid_spec=grid_spec,
        compiler_params=pltpu.CompilerParams(
            dimension_semantics=("parallel", "parallel", "arbitrary"),
        ),
        cost_estimate=cost,
    )(x_pad, w_t, b3, g_pad)

    return out[:B]


def brute_force_moe_ref(inp, gate_idx, gate_score, weights, biases):
    We = weights[gate_idx]                      # (B, K, D, D)
    Be = biases[gate_idx]                       # (B, K, D)
    y = jnp.einsum("bd,bkod->bko", inp, We) + Be
    return jnp.einsum("bk,bkd->bd", gate_score, y)


if __name__ == "__main__":
    num_expert = 8
    d_model = 128
    batch = 4
    top_k = 2

    key = jax.random.PRNGKey(0)
    k_inp, k_idx, k_sc, k_w, k_b = jax.random.split(key, 5)

    inp = jax.random.normal(k_inp, (batch, d_model), dtype=jnp.float32)
    gate_idx = jax.random.randint(k_idx, (batch, top_k), 0, num_expert,
                                  dtype=jnp.int32)
    gate_score = jax.nn.softmax(
        jax.random.normal(k_sc, (batch, top_k), dtype=jnp.float32), axis=-1)

    # Deterministic expert parameters (nn.Linear(d_model, d_model) per expert).
    weights = jax.random.normal(
        k_w, (num_expert, d_model, d_model), dtype=jnp.float32) * 0.02
    biases = jax.random.normal(
        k_b, (num_expert, d_model), dtype=jnp.float32) * 0.02

    out = brute_force_moe(inp, gate_idx, gate_score, weights, biases)
    out = jax.block_until_ready(out)

    ref = brute_force_moe_ref(inp, gate_idx, gate_score, weights, biases)
    assert out.shape == (batch, d_model)
    assert jnp.allclose(out, ref, rtol=1e-5, atol=1e-5), "mismatch vs reference"

    print("KERNEL_OK")
</pallas_src>

<mosaic_0001>
module attributes {stable_mosaic.version = 11 : i64} {
  func.func @_moe_kernel(%arg0: i32, %arg1: i32, %arg2: i32, %arg3: memref<8x128xf32, #tpu.memory_space<vmem>>, %arg4: memref<1x128x128xf32, #tpu.memory_space<vmem>>, %arg5: memref<1x1x128xf32, #tpu.memory_space<vmem>>, %arg6: memref<8x8xf32, #tpu.memory_space<vmem>>, %arg7: memref<8x128xf32, #tpu.memory_space<vmem>>, %arg8: memref<8x128xf32, #tpu.memory_space<vmem>>) attributes {dimension_semantics = [#tpu.dimension_semantics<parallel>, #tpu.dimension_semantics<parallel>, #tpu.dimension_semantics<arbitrary>], iteration_bounds = array<i64: 1, 1, 8>, scalar_prefetch = 0 : i64, scratch_operands = 1 : i64, tpu.core_type = #tpu.core_type<tc>, window_params = [{transform_indices = @transform_0, window_bounds = array<i64: 8, 128>}, {transform_indices = @transform_1, window_bounds = array<i64: 1, 128, 128>}, {transform_indices = @transform_2, window_bounds = array<i64: 1, 1, 128>}, {transform_indices = @transform_3, window_bounds = array<i64: 8, 8>}, {transform_indices = @transform_4, window_bounds = array<i64: 8, 128>}]} {
    %c0_i32 = arith.constant 0 : i32
    %0 = arith.cmpi eq, %arg2, %c0_i32 : i32
    %1 = arith.extui %0 : i1 to i32
    %c0_i32_0 = arith.constant 0 : i32
    %2 = arith.cmpi ne, %1, %c0_i32_0 : i32
    scf.if %2 {
      %cst_17 = arith.constant 0.000000e+00 : f32
      %27 = vector.broadcast %cst_17 : f32 to vector<8x128xf32>
      %c0_18 = arith.constant 0 : index
      %c0_19 = arith.constant 0 : index
      %28 = vector.load %arg8[%c0_18, %c0_19] : memref<8x128xf32, #tpu.memory_space<vmem>>, vector<8x128xf32>
      tpu.vector_store %arg8[%c0_18, %c0_19], %27 {strides = array<i32>} : memref<8x128xf32, #tpu.memory_space<vmem>>, vector<8x128xf32>,
    } else {
    }
    %c0 = arith.constant 0 : index
    %c0_1 = arith.constant 0 : index
    %3 = vector.load %arg3[%c0, %c0_1] : memref<8x128xf32, #tpu.memory_space<vmem>>, vector<8x128xf32>
    %c0_2 = arith.constant 0 : index
    %c0_3 = arith.constant 0 : index
    %c0_4 = arith.constant 0 : index
    %4 = vector.load %arg4[%c0_2, %c0_3, %c0_4] : memref<1x128x128xf32, #tpu.memory_space<vmem>>, vector<1x128x128xf32>
    %5 = vector.shape_cast %4 : vector<1x128x128xf32> to vector<128x128xf32>
    %c0_5 = arith.constant 0 : index
    %c0_6 = arith.constant 0 : index
    %c0_7 = arith.constant 0 : index
    %6 = vector.load %arg5[%c0_5, %c0_6, %c0_7] : memref<1x1x128xf32, #tpu.memory_space<vmem>>, vector<1x1x128xf32>
    %7 = vector.shape_cast %6 : vector<1x1x128xf32> to vector<1x128xf32>
    %cst = arith.constant dense<0.000000e+00> : vector<8x128xf32>
    %8 = tpu.matmul %3, %5, %cst {dimension_numbers = #tpu.dot_dimension_numbers<[1], [0], [0], [1], [0, 0, 1, 1], [], []>} : vector<8x128xf32>, vector<128x128xf32>, vector<8x128xf32> -> vector<8x128xf32>
    %9 = vector.broadcast %7 : vector<1x128xf32> to vector<8x128xf32>
    %10 = arith.addf %8, %9 : vector<8x128xf32>
    %c0_8 = arith.constant 0 : index
    %c0_9 = arith.constant 0 : index
    %11 = vector.load %arg6[%c0_8, %c0_9] : memref<8x8xf32, #tpu.memory_space<vmem>>, vector<8x8xf32>
    %12 = tpu.iota {dimensions = array<i32: 1>} : vector<8x8xi32>
    %13 = vector.broadcast %arg2 : i32 to vector<8x8xi32>
    %14 = arith.cmpi eq, %12, %13 : vector<8x8xi32>
    %cst_10 = arith.constant 0.000000e+00 : f32
    %15 = vector.broadcast %cst_10 : f32 to vector<8x8xf32>
    %16 = arith.select %14, %11, %15 : vector<8x8xi1>, vector<8x8xf32>
    %cst_11 = arith.constant dense<0.000000e+00> : vector<8xf32>
    %17 = vector.multi_reduction <add>, %16, %cst_11 [1] : vector<8x8xf32> to vector<8xf32>
    %18 = vector.shape_cast %17 : vector<8xf32> to vector<8x1xf32>
    %c0_12 = arith.constant 0 : index
    %c0_13 = arith.constant 0 : index
    %19 = vector.load %arg8[%c0_12, %c0_13] : memref<8x128xf32, #tpu.memory_space<vmem>>, vector<8x128xf32>
    %20 = vector.broadcast %18 : vector<8x1xf32> to vector<8x128xf32>
    %21 = arith.mulf %20, %10 : vector<8x128xf32>
    %22 = arith.addf %19, %21 : vector<8x128xf32>
    %c0_14 = arith.constant 0 : index
    %c0_15 = arith.constant 0 : index
    %23 = vector.load %arg8[%c0_14, %c0_15] : memref<8x128xf32, #tpu.memory_space<vmem>>, vector<8x128xf32>
    tpu.vector_store %arg8[%c0_14, %c0_15], %22 {strides = array<i32>} : memref<8x128xf32, #tpu.memory_space<vmem>>, vector<8x128xf32>,
    %c7_i32 = arith.constant 7 : i32
    %24 = arith.cmpi eq, %arg2, %c7_i32 : i32
    %25 = arith.extui %24 : i1 to i32
    %c0_i32_16 = arith.constant 0 : i32
    %26 = arith.cmpi ne, %25, %c0_i32_16 : i32
    scf.if %26 {
      %c0_17 = arith.constant 0 : index
      %c0_18 = arith.constant 0 : index
      %27 = vector.load %arg8[%c0_17, %c0_18] : memref<8x128xf32, #tpu.memory_space<vmem>>, vector<8x128xf32>
      %c0_19 = arith.constant 0 : index
      %c0_20 = arith.constant 0 : index
      %28 = vector.load %arg7[%c0_19, %c0_20] : memref<8x128xf32, #tpu.memory_space<vmem>>, vector<8x128xf32>
      tpu.vector_store %arg7[%c0_19, %c0_20], %27 {strides = array<i32>} : memref<8x128xf32, #tpu.memory_space<vmem>>, vector<8x128xf32>,
    } else {
    }
    return
  }
  func.func @transform_0(%arg0: i32, %arg1: i32, %arg2: i32) -> (i32, i32) {
    %c0_i32 = arith.constant 0 : i32
    %c0_i32_0 = arith.constant 0 : i32
    return %arg0, %c0_i32 : i32, i32
  }
  func.func @transform_1(%arg0: i32, %arg1: i32, %arg2: i32) -> (i32, i32, i32) {
    %c0_i32 = arith.constant 0 : i32
    %c0_i32_0 = arith.constant 0 : i32
    return %arg2, %c0_i32, %arg1 : i32, i32, i32
  }
  func.func @transform_2(%arg0: i32, %arg1: i32, %arg2: i32) -> (i32, i32, i32) {
    %c0_i32 = arith.constant 0 : i32
    %c0_i32_0 = arith.constant 0 : i32
    return %arg2, %c0_i32, %arg1 : i32, i32, i32
  }
  func.func @transform_3(%arg0: i32, %arg1: i32, %arg2: i32) -> (i32, i32) {
    %c0_i32 = arith.constant 0 : i32
    %c0_i32_0 = arith.constant 0 : i32
    return %arg0, %c0_i32 : i32, i32
  }
  func.func @transform_4(%arg0: i32, %arg1: i32, %arg2: i32) -> (i32, i32) {
    %c0_i32 = arith.constant 0 : i32
    return %arg0, %arg1 : i32, i32
  }
}

</mosaic_0001>

<bundles_post_ra>
// kernel: tpu_custom_call.1
= control target key start
LH: loop header
LB: loop body
LE: loop exit
PB: predicated region body
PF: predicated region fallthrough
CT: control target
= control target key end

     0   :  { %9 = vsyncpa [#allocation4], 0  ;;  %s1138_s0 = inlined_call_operand.hbm [shape: f32[8,128], index: 0, kind: input, shape index: {}]   ;;  %s1139_s1 = inlined_call_operand.hbm [shape: f32[8,128,128], index: 1, kind: input, shape index: {}]   ;;  %s1140_s2 = inlined_call_operand.hbm [shape: f32[8,1,128], index: 2, kind: input, shape index: {}]   ;;  %s1141_s3 = inlined_call_operand.hbm [shape: f32[8,8], index: 3, kind: input, shape index: {}]   ;;  %s1142_s4 = inlined_call_operand.hbm [shape: f32[8,128], index: 4, kind: output, shape index: {}]  }
   0x1   :  { %10 = vsyncpa [#allocation7], 0 }
   0x2   :  { %12 = vsyncpa [#allocation7 + $0x1], 0 }
   0x3   :  { %13 = vsyncpa [#allocation10], 0 }
   0x4   :  { %14 = vsyncpa [#allocation5], 0  ;;  %s944_s15 = smov 0   ;;  %s946_s16 = smov 0  }
   0x5   :  { %s948_s17 = smov 0   ;;  %s950_s18 = smov 0  }
   0x6   :  { %s952_s19 = smov 0   ;;  %s954_s20 = smov 0  }
   0x7 LB: > { %s32_s21 = sadd.s32 1, %s903_s19  ;;  %s74_s22 = sadd.s32 1, %s895_s17  ;;  %s907_s20 = sphi %s954_s20, %s20_s20   ;;  %s903_s19 = sphi %s952_s19, %s1165_s19   ;;  %s899_s18 = sphi %s950_s18, %s1164_s18   ;;  %s895_s17 = sphi %s948_s17, %s1163_s17   ;;  %s891_s16 = sphi %s946_s16, %s1162_s16   ;;  %s887_s15 = sphi %s944_s15, %s1161_s15  }
   0x8   : > { %p33_p0 = scmp.ge.s32.totalorder %s32_s21, 8  ;;  %p81_p1 = scmp.ne.s32.totalorder %s895_s17, %s891_s16 }
   0x9   : > { %p82_p2 = scmp.eq.s32.totalorder %s907_s20, 0  ;;  %p652_p4 = scmp.lt.s32.totalorder %s907_s20, 8 }
   0xa   : > { %s1167_s21 = smov (%p33_p0, %s32_s21), 0  ;;  %s219_s24 = sand.u32 1, %s907_s20  }
   0xb   : > { %p83_p3 = por %p82_p2, %p81_p1  ;;  %s69_s23 = ssub.s32 %s903_s19, %s1167_s21 }
   0xc   : > { %p72_p5 = scmp.eq.s32.totalorder %s69_s23, 0  ;;  %s221_s25 = sand.u32 1, %s895_s17  }
   0xd   : > { %s567_s26 = sshll.u32 %s903_s19, 11  ;;  %s552_s28 = sshll.u32 %s221_s25, 7 }
   0xe   : > { %s988_s27 = scalar_select %p72_p5, %s895_s17, %s74_s22  }
   0xf   : > { %s230_s5 = scalar_lea.hbm %s1139_s1, %s567_s26  ;;  %p995_p6 = pnand %p652_p4, %p83_p3 }
  0x10   : > { %s223_s7 = scalar_lea.vmem [#allocation6], %s552_s28  ;;  %s999_s9 = scalar_lea.sflag [#allocation7], %s219_s24 }
  0x11   : > { %s1149_s6 = scalar_select %p995_p6, 1, 0 }
  0x12   : > { %s231_s8 = sshll.u32 %s223_s7, 4  ;;  %p1144_p7 = pneg %p995_p6  ;;  %s232_s8 = int_to_ptr.vmem [resolvable:$true] %s231_s8 }
  0x13   : > { %s726_s10 = scalar_lea.vmem %s232_s8, 2048  ;;  %s909_s11 = smov [#allocation6]  }
  0x14   : > { %p727_p8 = scmp.ne.s32.totalorder %s232_s8, %s726_s10  ;;  %s731_s12 = sshll.u32 %s909_s11, 4  ;;  %s732_s12 = int_to_ptr.vmem [resolvable:$false] %s731_s12 }
  0x15   : > { %s733_s13 = scalar_lea.vmem %s732_s12, 4096  ;;  %p734_p11 = scmp.lt.s32.totalorder %s232_s8, %s732_s12 }
  0x16   : > { %p729_p9 = pnand %p727_p8, %p1144_p7  ;;  %p735_p12 = scmp.lt.s32.totalorder %s733_s13, %s726_s10 }
  0x18   : > { %p730_p10 = pneg %p729_p9  ;;  %p736_p13 = por %p735_p12, %p734_p11 }
  0x1a   : > { %p737_p0 = pnand %p736_p13, %p730_p10 }
  0x1c   : > { %740 = shalt.err (!%p737_p0)
}
  0x1d   : > { %s910_s14 = smov 128   ;;  %s911_s22 = smov 8  }
  0x1e   : > { %646 = dma.hbm_to_vmem [thread:$0]  (!%p995_p6), %s230_s5, 2048, %s232_s8, %s999_s9, %s910_s14, %s910_s14, %s911_s22  }
  0x1f   : > { %s1010_s23 = sadd.s32 4294967295, %s907_s20   ;;  %p87_p1 = scmp.ne.s32.totalorder %s891_s16, %s887_s15 }
  0x20   : > { %p1143_p2 = scmp.eq.s32.totalorder %s1010_s23, 0  ;;  %p548_p3 = scmp.ge.s32.totalorder %s907_s20, 1 }
  0x21   : > { %p180_p4 = scmp.lt.s32.totalorder %s907_s20, 9  ;;  %s912_s28 = smov [#allocation3]  }
  0x22   : > { %p1019_p5 = por %p1143_p2, %p87_p1  ;;  %s195_s29 = sshll.u32 %s912_s28, 4  ;;  %s196_s29 = int_to_ptr.vmem [resolvable:$true] %s195_s29 }
  0x23   : > { %p1023_p8 = pnand %p548_p3, %p180_p4  ;;  %s913_s30 = smov [#allocation9]  }
  0x24   : > { %s1150_s24 = scalar_select %p1019_p5, 1, 0 }
  0x25   : > { %s1151_s26 = scalar_select %p1023_p8, 1, 0 }
  0x26   : > { %p636_p9 = pneg %p1023_p8  ;;  %s208_s15 = sshll.u32 %s913_s30, 4  ;;  %s209_s15 = int_to_ptr.vmem [resolvable:$true] %s208_s15 }
  0x27   : > { %s555_s7 = sshll.u32 %s903_s19, 4  ;;  %s244_s8 = scalar_lea.vmem [#allocation8], %s221_s25 }
  0x28   : > { %p1031_p10 = pnand %p636_p9, %p1143_p2  ;;  %s252_s10 = sshll.u32 %s244_s8, 4  ;;  %s253_s10 = int_to_ptr.vmem [resolvable:$true] %s252_s10 }
  0x29   : > { %s1041_s13 = scalar_lea.hbm %s1140_s2, %s555_s7  ;;  %s752_s14 = scalar_lea.vmem %s196_s29, 128 }
  0x2a   : > { %p743_p11 = pneg %p1031_p10  ;;  %p753_p12 = scmp.ne.s32.totalorder %s196_s29, %s752_s14 }
  0x2b   : > { %p760_p1 = scmp.lt.s32.totalorder %s196_s29, %s196_s29  ;;  %p761_p3 = scmp.lt.s32.totalorder %s752_s14, %s752_s14 }
  0x2c   : > { %p755_p13 = pnand %p753_p12, %p743_p11 }
  0x2d   : > { %p762_p4 = por %p761_p3, %p760_p1 }
  0x2e   : > { %p756_p0 = pneg %p755_p13 }
  0x30   : > { %p763_p9 = pnand %p762_p4, %p756_p0 }
  0x32   : > { %766 = shalt.err (!%p763_p9)
}
  0x33   : > { %639 = dma.hbm_to_vmem [thread:$0]  (!%p1031_p10), %s1138_s0, 128, %s196_s29, [#allocation4]  }
  0x34   : > { %s778_s28 = scalar_lea.vmem %s209_s15, 128  ;;  %p786_p12 = scmp.lt.s32.totalorder %s209_s15, %s209_s15 }
  0x35   : > { %p779_p2 = scmp.ne.s32.totalorder %s209_s15, %s778_s28  ;;  %p787_p13 = scmp.lt.s32.totalorder %s778_s28, %s778_s28 }
  0x37   : > { %p781_p7 = pnand %p779_p2, %p743_p11  ;;  %p788_p8 = por %p787_p13, %p786_p12 }
  0x39   : > { %p782_p5 = pneg %p781_p7 }
  0x3b   : > { %p789_p6 = pnand %p788_p8, %p782_p5 }
  0x3d   : > { %792 = shalt.err (!%p789_p6)
}
  0x3e   : > { %642 = dma.hbm_to_vmem [thread:$0]  (!%p1031_p10), %s1141_s3, 128, %s209_s15, [#allocation10]  }
  0x3f   : > { %s806_s29 = scalar_lea.vmem %s253_s10, 16  ;;  %p1153_p1 = scmp.ne.s32.totalorder %s1149_s6, 0 }
  0x40   : > { %p807_p0 = scmp.ne.s32.totalorder %s253_s10, %s806_s29  ;;  %s914_s8 = smov [#allocation8]  }
  0x41   : > { %p1154_p3 = pneg %p1153_p1  ;;  %s811_s11 = sshll.u32 %s914_s8, 4  ;;  %s812_s11 = int_to_ptr.vmem [resolvable:$false] %s811_s11 }
  0x42   : > { %s813_s12 = scalar_lea.vmem %s812_s11, 32  ;;  %p814_p7 = scmp.lt.s32.totalorder %s253_s10, %s812_s11 }
  0x43   : > { %p809_p4 = pnand %p807_p0, %p1154_p3  ;;  %p815_p6 = scmp.lt.s32.totalorder %s813_s12, %s806_s29 }
  0x45   : > { %p810_p2 = pneg %p809_p4  ;;  %p816_p5 = por %p815_p6, %p814_p7 }
  0x47   : > { %p817_p8 = pnand %p816_p5, %p810_p2 }
  0x49   : > { %820 = shalt.err (!%p817_p8)
}
  0x4a   : > { %649 = dma.hbm_to_vmem [thread:$0]  (!%p1153_p1), %s1041_s13, 16, %s253_s10, %s999_s9  }
  0x4b   : > { %p1155_p10 = scmp.ne.s32.totalorder %s1151_s26, 0 }
  0x4c   : > { %p1156_p11 = scmp.eq.s32.totalorder (!%p1155_p10), %s1010_s23, 0 }
  0x4d   : > { %261 = sbr.rel (%p1155_p10) target bundleno = 356 (0x164), region = 36 }
  0x52   : > { %870 = dma.done.wait (%p1156_p11), [#allocation4], 128   ;;  %p1157_p9 = pmov %p1156_p11 }
  0x53   : > { %s267_s15 = sand.u32 1, %s1010_s23   ;;  %s269_s5 = sand.u32 1, %s891_s16  }
  0x54   : > { %872 = vsyncadd (%p1157_p9), [#allocation4], 4294967168  ;;  %s558_s14 = sshll.u32 %s269_s5, 7  ;;  %s268_s25 = scalar_lea.sflag [#allocation7], %s267_s15 }
  0x55   : > { %s1076_s6 = scalar_lea.vmem [#allocation6], %s558_s14  ;;  %p1158_p12 = scmp.ne.s32.totalorder %s1150_s24, 0 }
  0x57   : > { %874 = dma.done.wait (%p1158_p12), %s268_s25, 2064  }
  0x58   : > { %876 = vsyncadd (%p1158_p12), %s268_s25, 4294965232  ;;  %s1082_s9 = scalar_lea.vmem [#allocation8], %s269_s5  ;;  %p1159_p13 = pmov %p1157_p9 }
  0x59   : > { %p1160_p0 = pmov %p1157_p9 }
  0x5a   : > { %878 = dma.done.wait (%p1159_p13), [#allocation10], 128  }
  0x5b   : > { %880 = vsyncadd (%p1160_p0), [#allocation10], 4294967168  ;;  %p560_p1 = scmp.ne.s32.totalorder %s899_s18, 0 }
  0x5d   : > { %310 = sbr.rel (%p560_p1) target bundleno = 100 (0x64), region = 56 }
  0x62   : > { %v915_v0 = vmov 0.0  }
  0x63   : > { %311 = vst [vmem:[#allocation2] sm:$0xff] %v915_v0 }
  0x64 PF: > { %v328_v1 = vld [vmem:[%s1076_s6 + $0x78] sm:$0xff]  ;;  %v407_v2 = vlaneseq  ;;  %v916_v3 = vmov 0.0   ;;  %v327_v4 = vld [vmem:[%s1076_s6 + $0x70] sm:$0xff]  ;;  %vm917_vm0 = vmmov 0   ;;  %v409_v5 = vstv %s899_s18  ;;  %v326_v7 = vld [vmem:[%s1076_s6 + $0x68] sm:$0xff]  ;;  %p562_p3 = scmp.ne.s32.totalorder %s899_s18, 7 }
  0x65   : > { %585 = vmatprep.subr.mxu0 %v916_v3  ;;  %617 = vmatprep.mubr.msk.f32.mxu0 %vm917_vm0, %v916_v3  ;;  %vm412_vm2 = vcmask 64512   ;;  %v325_v8 = vld [vmem:[%s1076_s6 + $0x60] sm:$0xff]  ;;  %v324_v11 = vld [vmem:[%s1076_s6 + $0x58] sm:$0xff]  ;;  %v323_v13 = vld [vmem:[%s1076_s6 + $0x50] sm:$0xff] }
  0x66   : > { %586 = vmatpush3.msra.mxu0 %v328_v1  ;;  %v408_v6 = vand.u32 127, %v407_v2  ;;  %v406_v9 = vld [vmem:[#allocation9] sm:$0xff]  ;;  %v320_v16 = vld [vmem:[%s1076_s6 + $0x38] sm:$0xff]  ;;  %v319_v17 = vld [vmem:[%s1076_s6 + $0x30] sm:$0xff] }
  0x67   : > { %587 = vmatprep.subr.mxu0 %v916_v3  ;;  %v322_v14 = vld [vmem:[%s1076_s6 + $0x48] sm:$0xff]  ;;  %v321_v15 = vld [vmem:[%s1076_s6 + $0x40] sm:$0xff]  ;;  %v316_v20 = vld [vmem:[%s1076_s6 + $0x18] sm:$0xff] }
  0x68   : > { %588 = vmatpush3.msra.mxu0 %v327_v4  ;;  %vm410_vm1 = vcmp.eq.s32.totalorder %v408_v6, %v409_v5  ;;  %v318_v18 = vld [vmem:[%s1076_s6 + $0x28] sm:$0xff]  ;;  %v317_v19 = vld [vmem:[%s1076_s6 + $0x20] sm:$0xff]  ;;  %v315_v21 = vld [vmem:[%s1076_s6 + $0x10] sm:$0xff] }
  0x69   : > { %589 = vmatprep.subr.mxu0 %v916_v3  ;;  %v411_v10 = vsel %vm410_vm1, %v406_v9, 0.0  ;;  %v314_v22 = vld [vmem:[%s1076_s6 + $0x8] sm:$0xff]  ;;  %v313_v23 = vld [vmem:[%s1076_s6] sm:$0xff]  ;;  %v312_v24 = vld [vmem:[#allocation3] sm:$0xff] }
  0x6a   : > { %590 = vmatpush3.msra.mxu0 %v326_v7  ;;  %v413_v12 = vsel %vm412_vm2, %v411_v10, 0.0  ;;  %v561_v25 = vld [vmem:[%s1082_s9] ss:$0 sm:$0xff] }
  0x6b   : > { %591 = vmatprep.subr.mxu0 %v916_v3  ;;  %414 = vadd.xlane.f32.xlu0 %v413_v12  ;;  %v416_v30 = vld [vmem:[#allocation2] sm:$0xff] }
  0x6c   : > { %592 = vmatpush3.msra.mxu0 %v325_v8 }
  0x6d   : > { %593 = vmatprep.subr.mxu0 %v916_v3 }
  0x6e   : > { %594 = vmatpush3.msra.mxu0 %v324_v11 }
  0x6f   : > { %595 = vmatprep.subr.mxu0 %v916_v3 }
  0x70   : > { %596 = vmatpush3.msra.mxu0 %v323_v13 }
  0x71   : > { %597 = vmatprep.subr.mxu0 %v916_v3 }
  0x72   : > { %598 = vmatpush3.msra.mxu0 %v322_v14 }
  0x73   : > { %599 = vmatprep.subr.mxu0 %v916_v3 }
  0x74   : > { %600 = vmatpush3.msra.mxu0 %v321_v15 }
  0x75   : > { %601 = vmatprep.subr.mxu0 %v916_v3 }
  0x76   : > { %602 = vmatpush3.msra.mxu0 %v320_v16 }
  0x77   : > { %603 = vmatprep.subr.mxu0 %v916_v3 }
  0x78   : > { %604 = vmatpush3.msra.mxu0 %v319_v17 }
  0x79   : > { %605 = vmatprep.subr.mxu0 %v916_v3 }
  0x7a   : > { %606 = vmatpush3.msra.mxu0 %v318_v18 }
  0x7b   : > { %607 = vmatprep.subr.mxu0 %v916_v3 }
  0x7c   : > { %608 = vmatpush3.msra.mxu0 %v317_v19 }
  0x7d   : > { %609 = vmatprep.subr.mxu0 %v916_v3 }
  0x7e   : > { %610 = vmatpush3.msra.mxu0 %v316_v20 }
  0x7f   : > { %611 = vmatprep.subr.mxu0 %v916_v3 }
  0x80   : > { %612 = vmatpush3.msra.mxu0 %v315_v21 }
  0x81   : > { %613 = vmatprep.subr.mxu0 %v916_v3 }
  0x82   : > { %614 = vmatpush3.msra.mxu0 %v314_v22 }
  0x83   : > { %615 = vmatprep.subr.mxu0 %v916_v3 }
  0x84   : > { %616 = vmatpush3.msra.mxu0 %v313_v23 }
  0x85   : > { %618 = vmatmul.mubr.f32.vlgmr.msra.gmra.mxu0 %v312_v24 }
  0xf4   : > { %v415_v27 = vpop.xlane.xlu0 %414 }
 0x145   : > { %v402_v26 = vpop.f32.mrf.mxu0 }
 0x146   : > { %v403_v28 = vadd.f32 %v561_v25, %v402_v26 }
 0x147   : > { %v619_v29 = vpop.f32.mrf.mxu0 }
 0x148   : > { %v417_v31 = vmul.f32 %v415_v27, %v403_v28  ;;  %423 = sbr.rel (%p562_p3) target bundleno = 341 (0x155), region = 60 }
 0x14a   : > { %v418_v32 = vadd.f32 %v417_v31, %v416_v30 }
 0x14c   : > { %419 = vst [vmem:[#allocation2] sm:$0xff] %v418_v32 }
 0x153   : > { %v424_v33 = vld [vmem:[#allocation2] sm:$0xff] }
 0x154   : > { %425 = vst [vmem:[#allocation11] sm:$0xff] %v424_v33 }
 0x155 PF: > { %p655_p4 = scmp.eq.s32.totalorder %s1010_s23, 7  ;;  %s918_s24 = smov [#allocation11]  }
 0x156   : > { %s436_s26 = sshll.u32 %s918_s24, 4  ;;  %s437_s26 = int_to_ptr.vmem [resolvable:$true] %s436_s26 }
 0x157   : > { %s821_s10 = scalar_lea.vmem %s437_s26, 128  ;;  %p828_p5 = scmp.lt.s32.totalorder %s437_s26, %s437_s26 }
 0x158   : > { %p822_p2 = scmp.ne.s32.totalorder %s437_s26, %s821_s10  ;;  %p829_p8 = scmp.lt.s32.totalorder %s821_s10, %s821_s10 }
 0x15a   : > { %p823_p7 = pnand %p822_p2, %p655_p4  ;;  %p830_p10 = por %p829_p8, %p828_p5 }
 0x15c   : > { %p824_p6 = pneg %p823_p7 }
 0x15e   : > { %p831_p11 = pnand %p830_p10, %p824_p6 }
 0x160   : > { %834 = shalt.err (!%p831_p11)
}
 0x161   : > { %633 = dma.vmem_to_hbm [thread:$0]  (%p655_p4), %s437_s26, 128, %s1142_s4, [#allocation5]  }
 0x162   : > { %882 = dma.done.wait (%p655_p4), [#allocation5], 128  }
 0x163   : > { %884 = vsyncadd (%p655_p4), [#allocation5], 4294967168 }
 0x164 PF: > { %s20_s20 = sadd.s32 1, %s907_s20   ;;  %s1161_s15 = smov %s891_s16 }
 0x165   : > { %p17_p9 = scmp.ge.s32.totalorder %s20_s20, 10   ;;  %s1162_s16 = smov %s895_s17 }
 0x166   : > { %s1163_s17 = smov %s988_s27  ;;  %s1164_s18 = smov %s903_s19 }
 0x167   : > { %s1165_s19 = smov %s1167_s21  ;;  %19 = sbr.rel (!%p17_p9) target bundleno = 7 (0x7), region = 104 }
 0x16c   :  { %449 = vsyncpa [#allocation4], 1 }
 0x16d   :  { %451 = vsyncpa [#allocation4 + $0x1], 1 }
 0x16e   :  { %452 = vsyncpa [#allocation7], 1 }
 0x16f   :  { %454 = vsyncpa [#allocation7 + $0x1], 1 }
 0x170   :  { %455 = vsyncpa [#allocation10], 1 }
 0x171   :  { %456 = vsyncpa [#allocation5], 1 }
 0x172   :  { %458 = vsyncpa [#allocation5 + $0x1], 1 }

</bundles_post_ra>
